<compile_context>
chip_gen: v6e
topology: v6e:2x2x1
jax: 0.10.0
libtpu: 0.0.40
codegen_flags: <defaults>
</compile_context>

<pallas_src>
import jax
import jax.numpy as jnp
from jax.experimental import pallas as pl
from jax.experimental.pallas import tpu as pltpu

_LANE = 128
_INV_SQRT2 = 0.7071067811865475


def _round_up(n, m=_LANE):
    return ((n + m - 1) // m) * m


def _pad_mat(w, rows, cols):
    return jnp.pad(w, ((0, rows - w.shape[0]), (0, cols - w.shape[1])))


def _pad_row(v, cols):
    return jnp.pad(v, (0, cols - v.shape[0])).reshape(1, cols)


# ----------------------------------------------------------------------------
# one-off probe of pltpu.roll's rotate direction (cached; call outside jit).
# Makes the tap-shift code convention-proof instead of assuming a sign.
# ----------------------------------------------------------------------------
_ROLL_IS_JNP_LIKE = None


def _roll_is_jnp_like():
    global _ROLL_IS_JNP_LIKE
    if _ROLL_IS_JNP_LIKE is None:
        def probe(x_ref, o_ref):
            o_ref[...] = pltpu.roll(x_ref[...], shift=1, axis=0)

        x = jax.lax.broadcasted_iota(jnp.float32, (8, _LANE), 0)
        y = pl.pallas_call(
            probe, out_shape=jax.ShapeDtypeStruct((8, _LANE), jnp.float32))(x)
        # jnp.roll-like: out[0] = in[-1] = 7 ; opposite convention: out[0] = 1
        _ROLL_IS_JNP_LIKE = bool(float(y[0, 0]) > 3.5)
    return _ROLL_IS_JNP_LIKE


# ----------------------------------------------------------------------------
# in-kernel elementwise helpers
# ----------------------------------------------------------------------------
def _gelu(x):
    # exact-erf GELU (PyTorch F.gelu default).  erf via A&S 7.1.26
    # (max abs err ~1.5e-7); divide -> EUP reciprocal, exp -> EUP.
    z = x * _INV_SQRT2
    a1, a2, a3, a4, a5 = (0.254829592, -0.284496736, 1.421413741,
                          -1.453152027, 1.061405429)
    p = 0.3275911
    sgn = jnp.where(z >= 0.0, 1.0, -1.0)
    az = jnp.abs(z)
    t = pl.reciprocal(1.0 + p * az, approx=True)
    poly = ((((a5 * t + a4) * t + a3) * t + a2) * t + a1) * t
    erf = sgn * (1.0 - poly * jnp.exp(-az * az))
    return 0.5 * x * (1.0 + erf)


# ----------------------------------------------------------------------------
# the single fused kernel (bb batch elements per grid step)
# ----------------------------------------------------------------------------
def _make_fused_kernel(block_meta, apply_sigmoid, bb, T, roll_jnp_like):
    M = bb * T

    def shift_amounts(d):
        # roll amounts so that  down: out[r] = u[r-d]   up: out[r] = u[r+d]
        if roll_jnp_like:
            return d, (M - d) % M
        return (M - d) % M, d

    def kernel(*refs):
        it = iter(refs)
        x_ref = next(it)
        t_ref = next(it)
        fcw_ref = next(it)
        fcb_ref = next(it)
        blocks = []
        for d, has_proj, cp in block_meta:
            w1 = next(it); b1 = next(it); w2 = next(it); b2 = next(it)
            wp = bp = None
            if has_proj:
                wp = next(it); bp = next(it)
            blocks.append((d, cp, w1, b1, w2, b2, wp, bp))
        pool_ref = next(it)
        pw1_ref = next(it); pb1_ref = next(it)
        pw2_ref = next(it); pb2_ref = next(it)
        o_ref = next(it)

        row_t = t_ref[...]                                   # (M, 1) int32

        def conv3(h, wc_ref, b_ref, d, cp):
            # SamePadConv(k=3, dilation=d) as ONE bf16 MXU matmul against the
            # column-stacked taps [W0|W1|W2]; the per-tap time shifts move to
            # the OUTPUT (lane slices at 128-multiples + XLU rolls + masks),
            # so no (M, 3C) im2col input is ever materialized.
            u = jnp.dot(h.astype(jnp.bfloat16), wc_ref[...],
                        preferred_element_type=jnp.float32)   # (M, 3*cp) f32
            y = u[:, cp:2 * cp]
            if d < T:                       # else the shifted taps are zeros
                s_dn, s_up = shift_amounts(d)
                u0 = pltpu.roll(u[:, :cp], shift=s_dn, axis=0)
                u2 = pltpu.roll(u[:, 2 * cp:], shift=s_up, axis=0)
                y = (y + jnp.where(row_t >= d, u0, 0.0)
                       + jnp.where(row_t < T - d, u2, 0.0))
            return y + b_ref[...]

        # ---- TSEncoder.input_fc (Din lane-padded on the host) -------------
        x = x_ref[...].reshape(M, x_ref.shape[-1])
        h = jnp.dot(x.astype(jnp.bfloat16), fcw_ref[...],
                    preferred_element_type=jnp.float32) + fcb_ref[...]

        # ---- DilatedConvEncoder (activation stays in VMEM/vregs) ----------
        # TODO(synk): for very long T the live (M, 3C) slabs should be tiled
        # over time (halo = 2^depth) to stay inside v7x's 64 MiB VMEM.
        for d, cp, w1, b1, w2, b2, wp, bp in blocks:
            if wp is not None:
                res = jnp.dot(h.astype(jnp.bfloat16), wp[...],
                              preferred_element_type=jnp.float32) + bp[...]
            else:
                res = h
            a = _gelu(h)
            a = conv3(a, w1, b1, d, cp)
            a = _gelu(a)
            a = conv3(a, w2, b2, d, cp)
            h = a + res

        # ---- avg pool over time: tiny f32 matmul with block-diag 1/T mat --
        pooled = jnp.dot(pool_ref[...], h,
                         preferred_element_type=jnp.float32)   # (bb, Ep)

        # ---- ProjectionHead (eval BatchNorm folded into pw1/pb1 on host) --
        z = jnp.dot(pooled.astype(jnp.bfloat16), pw1_ref[...],
                    preferred_element_type=jnp.float32) + pb1_ref[...]
        z = jnp.maximum(z, 0.0)
        out = jnp.dot(z.astype(jnp.bfloat16), pw2_ref[...],
                      preferred_element_type=jnp.float32) + pb2_ref[...]
        if apply_sigmoid:
            # Faithful to the reference: ProjectionHead applies sigmoid when
            # its output_dims == 2 AND FTClassifier applies it once more.
            out = jax.nn.sigmoid(jax.nn.sigmoid(out))
        o_ref[0] = out.astype(o_ref.dtype)

    return kernel


# ----------------------------------------------------------------------------
# host-side parameter layout + fused forward
# ----------------------------------------------------------------------------
def ft_classifier_forward(x, params, p_output_dims, eps=1e-5, batch_block=8):
    """FTClassifier eval-mode forward (pool='avg') as one fused pallas_call."""
    # TODO(synk): only pool='avg' is implemented; the 'max'/None pooling and
    # the training-time mask_t/mask_f perturbations are not translated.
    B, T, Din = x.shape
    bb = max(1, min(batch_block, B))
    G = -(-B // bb)
    Bp = G * bb
    M = bb * T
    Din_p = _round_up(Din)
    Hp = _round_up(params["fc_w"].shape[1])

    # pad batch to a multiple of bb and features to a lane multiple (exact:
    # padded lanes/rows stay identically zero through the whole network)
    xp = jnp.pad(x.astype(jnp.float32),
                 ((0, Bp - B), (0, 0), (0, Din_p - Din)))
    t_idx = jnp.tile(jnp.arange(T, dtype=jnp.int32), bb).reshape(M, 1)

    flat_inputs = [
        xp, t_idx,
        _pad_mat(params["fc_w"], Din_p, Hp).astype(jnp.bfloat16),
        _pad_row(params["fc_b"], Hp),
    ]
    in_specs = [
        pl.BlockSpec((bb, T, Din_p), lambda g: (g, 0, 0)),     # x
        pl.BlockSpec((M, 1), lambda g: (0, 0)),                # local time idx
        pl.BlockSpec((Din_p, Hp), lambda g: (0, 0)),           # fc_w (bf16)
        pl.BlockSpec((1, Hp), lambda g: (0, 0)),               # fc_b
    ]

    block_meta = []
    cin_p = Hp
    for blk in params["blocks"]:
        cout_p = _round_up(blk["w1"].shape[2])
        has_proj = blk["wp"] is not None
        # taps stacked COLUMN-wise -> conv = h @ [W0|W1|W2]; shifts are
        # applied to the matmul output inside the kernel (no im2col input).
        w1c = jnp.concatenate([_pad_mat(blk["w1"][k], cin_p, cout_p)
                               for k in range(3)], axis=1).astype(jnp.bfloat16)
        w2c = jnp.concatenate([_pad_mat(blk["w2"][k], cout_p, cout_p)
                               for k in range(3)], axis=1).astype(jnp.bfloat16)
        flat_inputs += [w1c, _pad_row(blk["b1"], cout_p),
                        w2c, _pad_row(blk["b2"], cout_p)]
        in_specs += [
            pl.BlockSpec((cin_p, 3 * cout_p), lambda g: (0, 0)),
            pl.BlockSpec((1, cout_p), lambda g: (0, 0)),
            pl.BlockSpec((cout_p, 3 * cout_p), lambda g: (0, 0)),
            pl.BlockSpec((1, cout_p), lambda g: (0, 0)),
        ]
        if has_proj:
            flat_inputs += [
                _pad_mat(blk["wp"], cin_p, cout_p).astype(jnp.bfloat16),
                _pad_row(blk["bp"], cout_p)]
            in_specs += [
                pl.BlockSpec((cin_p, cout_p), lambda g: (0, 0)),
                pl.BlockSpec((1, cout_p), lambda g: (0, 0)),
            ]
        block_meta.append((int(blk["dilation"]), has_proj, cout_p))
        cin_p = cout_p

    Ep = cin_p
    # block-diagonal (bb, bb*T) average-pool matrix: pooled = P @ h_flat
    pool_mat = jnp.repeat(jnp.eye(bb, dtype=jnp.float32), T, axis=1) / float(T)
    flat_inputs.append(pool_mat)
    in_specs.append(pl.BlockSpec((bb, M), lambda g: (0, 0)))

    p_out = params["pw2"].shape[1]
    PHp = _round_up(params["pw1"].shape[1])
    Pp = _round_up(p_out)
    # fold eval-mode BatchNorm1d into the first head linear (2 tensors, not 6)
    scale = params["bn_g"] / jnp.sqrt(params["bn_v"] + eps)
    pw1_eff = params["pw1"] * scale[None, :]
    pb1_eff = (params["pb1"] - params["bn_m"]) * scale + params["bn_b"]
    flat_inputs += [
        _pad_mat(pw1_eff, Ep, PHp).astype(jnp.bfloat16), _pad_row(pb1_eff, PHp),
        _pad_mat(params["pw2"], PHp, Pp).astype(jnp.bfloat16),
        _pad_row(params["pb2"], Pp)]
    in_specs += [
        pl.BlockSpec((Ep, PHp), lambda g: (0, 0)),
        pl.BlockSpec((1, PHp), lambda g: (0, 0)),
        pl.BlockSpec((PHp, Pp), lambda g: (0, 0)),
        pl.BlockSpec((1, Pp), lambda g: (0, 0)),
    ]

    kernel = _make_fused_kernel(tuple(block_meta),
                                apply_sigmoid=(p_output_dims == 2),
                                bb=bb, T=T,
                                roll_jnp_like=_roll_is_jnp_like())

    # explicit VMEM budget: default double-buffering of the (constant) weight
    # slabs + live activations, clamped to a limit that is safe on all chips.
    param_bytes = sum(int(a.size) * a.dtype.itemsize for a in flat_inputs[1:])
    act_bytes = 4 * M * 3 * max(Hp, Ep) * 6
    vmem_budget = int(min(max(2 * param_bytes + act_bytes + (4 << 20),
                              32 << 20), 60 << 20))

    out = pl.pallas_call(
        kernel,
        out_shape=jax.ShapeDtypeStruct((G, bb, Pp), jnp.float32),
        grid=(G,),
        in_specs=in_specs,
        out_specs=pl.BlockSpec((1, bb, Pp), lambda g: (g, 0, 0)),
        compiler_params=pltpu.CompilerParams(
            dimension_semantics=("parallel",),     # batch shards across TCs
            vmem_limit_bytes=vmem_budget),
    )(*flat_inputs)
    return out.reshape(Bp, Pp)[:B, :p_out]          # drop batch/lane padding


# ----------------------------------------------------------------------------
# pure-JAX f32 reference (mirrors the PyTorch module, eval mode, pool='avg')
# ----------------------------------------------------------------------------
def _reference_forward(x, params, p_output_dims, eps=1e-5):
    def shift(h, s):
        B, T, C = h.shape
        if s == 0:
            return h
        if abs(s) >= T:
            return jnp.zeros_like(h)
        z = jnp.zeros((B, abs(s), C), h.dtype)
        if s > 0:                                    # out[t] = h[t - s]
            return jnp.concatenate([z, h[:, :T - s]], axis=1)
        return jnp.concatenate([h[:, -s:], z], axis=1)

    h = x @ params["fc_w"] + params["fc_b"]
    for blk in params["blocks"]:
        d = int(blk["dilation"])
        res = h if blk["wp"] is None else (h @ blk["wp"] + blk["bp"])
        a = jax.nn.gelu(h, approximate=False)
        a = (shift(a, d) @ blk["w1"][0] + a @ blk["w1"][1]
             + shift(a, -d) @ blk["w1"][2] + blk["b1"])
        a = jax.nn.gelu(a, approximate=False)
        a = (shift(a, d) @ blk["w2"][0] + a @ blk["w2"][1]
             + shift(a, -d) @ blk["w2"][2] + blk["b2"])
        h = a + res
    pooled = jnp.mean(h, axis=1)
    z = pooled @ params["pw1"] + params["pb1"]
    z = ((z - params["bn_m"]) * params["bn_g"]
         / jnp.sqrt(params["bn_v"] + eps) + params["bn_b"])
    z = jnp.maximum(z, 0.0)
    out = z @ params["pw2"] + params["pb2"]
    if p_output_dims == 2:
        out = jax.nn.sigmoid(jax.nn.sigmoid(out))
    return out


# ----------------------------------------------------------------------------
# deterministic parameter construction (PyTorch-default-style inits, eval mode)
# ----------------------------------------------------------------------------
def make_params(key, input_dims, enc_output_dims, hidden_dims, depth,
                p_hidden_dims, p_output_dims):
    keys = iter(jax.random.split(key, 128))

    def uni(shape, fan_in):
        bound = 1.0 / jnp.sqrt(jnp.float32(fan_in))
        return jax.random.uniform(next(keys), shape, jnp.float32,
                                  -bound, bound)

    params = {
        "fc_w": uni((input_dims, hidden_dims), input_dims),
        "fc_b": uni((hidden_dims,), input_dims),
    }
    channels = [hidden_dims] * depth + [enc_output_dims]
    blocks = []
    for i, cout in enumerate(channels):
        cin = hidden_dims if i == 0 else channels[i - 1]
        final = (i == len(channels) - 1)
        has_proj = (cin != cout) or final
        blocks.append({
            "dilation": 2 ** i,
            # conv weights stored as (k=3, Cin, Cout) == PyTorch (Cout,Cin,k).T
            "w1": uni((3, cin, cout), cin * 3),
            "b1": uni((cout,), cin * 3),
            "w2": uni((3, cout, cout), cout * 3),
            "b2": uni((cout,), cout * 3),
            "wp": uni((cin, cout), cin) if has_proj else None,
            "bp": uni((cout,), cin) if has_proj else None,
        })
    params["blocks"] = blocks
    params["pw1"] = uni((enc_output_dims, p_hidden_dims), enc_output_dims)
    params["pb1"] = uni((p_hidden_dims,), enc_output_dims)
    params["bn_g"] = jnp.ones((p_hidden_dims,), jnp.float32)
    params["bn_b"] = jnp.zeros((p_hidden_dims,), jnp.float32)
    params["bn_m"] = jnp.zeros((p_hidden_dims,), jnp.float32)
    params["bn_v"] = jnp.ones((p_hidden_dims,), jnp.float32)
    params["pw2"] = uni((p_hidden_dims, p_output_dims), p_hidden_dims)
    params["pb2"] = uni((p_output_dims,), p_hidden_dims)
    return params


if __name__ == "__main__":
    # small, forward-consistent shapes
    B, T = 4, 16
    input_dims = 8
    hidden_dims = 32       # TSEncoder hidden_dims
    enc_output_dims = 32   # TSEncoder / FTClassifier output_dims
    depth = 2              # -> 3 ConvBlocks, dilations 1, 2, 4
    p_hidden_dims = 32
    p_output_dims = 16     # != 2 -> no sigmoid branch

    key = jax.random.PRNGKey(0)
    k_x, k_p = jax.random.split(key)
    x = jax.random.normal(k_x, (B, T, input_dims), jnp.float32)
    params = make_params(k_p, input_dims, enc_output_dims, hidden_dims,
                         depth, p_hidden_dims, p_output_dims)

    out = ft_classifier_forward(x, params, p_output_dims, batch_block=2)
    out = jax.block_until_ready(out)

    assert out.shape == (B, p_output_dims), out.shape
    assert bool(jnp.all(jnp.isfinite(out)))

    # loose self-check vs the pure-JAX f32 reference (kernel uses bf16 MXU,
    # polynomial erf and an approximate EUP reciprocal -> ~1% expected error)
    ref = _reference_forward(x, params, p_output_dims)
    rel = float(jnp.linalg.norm(out - ref) / (jnp.linalg.norm(ref) + 1e-12))
    assert rel < 0.1, f"relative error vs reference too large: {rel}"
    print("KERNEL_OK")
</pallas_src>

<mosaic_0001>
module attributes {stable_mosaic.version = 11 : i64} {
  func.func @probe(%arg0: memref<8x128xf32, #tpu.memory_space<vmem>>, %arg1: memref<8x128xf32, #tpu.memory_space<vmem>>) attributes {dimension_semantics = [], scalar_prefetch = 0 : i64, scratch_operands = 0 : i64, tpu.core_type = #tpu.core_type<tc>} {
    %c0 = arith.constant 0 : index
    %c0_0 = arith.constant 0 : index
    %0 = vector.load %arg0[%c0, %c0_0] : memref<8x128xf32, #tpu.memory_space<vmem>>, vector<8x128xf32>
    %c1_i32 = arith.constant 1 : i32
    %1 = tpu.dynamic_rotate %0 by %c1_i32 dim 0 : vector<8x128xf32>, i32 -> vector<8x128xf32>
    %c0_1 = arith.constant 0 : index
    %c0_2 = arith.constant 0 : index
    %2 = vector.load %arg1[%c0_1, %c0_2] : memref<8x128xf32, #tpu.memory_space<vmem>>, vector<8x128xf32>
    tpu.vector_store %arg1[%c0_1, %c0_2], %1 {strides = array<i32>} : memref<8x128xf32, #tpu.memory_space<vmem>>, vector<8x128xf32>,
    return
  }
}

</mosaic_0001>

<bundles_post_ra>
// kernel: tpu_custom_call.1
= control target key start
LH: loop header
LB: loop body
LE: loop exit
PB: predicated region body
PF: predicated region fallthrough
CT: control target
= control target key end

     0   :  { %6 = vsyncpa [#allocation3], 0  ;;  %s103_s0 = inlined_call_operand.hbm [shape: f32[8,128], index: 0, kind: input, shape index: {}]   ;;  %s104_s1 = inlined_call_operand.hbm [shape: f32[8,128], index: 1, kind: output, shape index: {}]  }
   0x1   :  { %7 = vsyncpa [#allocation4], 0  ;;  %s85_s6 = smov [#allocation2]  }
   0x2   :  { %s14_s7 = sshll.u32 %s85_s6, 4  ;;  %s15_s7 = int_to_ptr.vmem [resolvable:$true] %s14_s7 }
   0x3   :  { %s49_s8 = scalar_lea.vmem %s15_s7, 128  ;;  %p54_p1 = scmp.lt.s32.totalorder %s15_s7, %s15_s7 }
   0x4   :  { %p50_p0 = scmp.ne.s32.totalorder %s15_s7, %s49_s8  ;;  %p55_p2 = scmp.lt.s32.totalorder %s49_s8, %s49_s8 }
   0x6   :  { %p56_p3 = por %p55_p2, %p54_p1 }
   0x8   :  { %p57_p4 = pnand %p56_p3, %p50_p0 }
   0xa   :  { %60 = shalt.err (!%p57_p4)
}
   0xb   :  { %17 = dma.hbm_to_vmem [thread:$0]  %s103_s0, 128, %s15_s7, [#allocation3]  }
   0xc   :  { %81 = dma.done.wait [#allocation3], 128  }
   0xd   :  { %82 = vsyncadd [#allocation3], 4294967168  ;;  %s86_s11 = smov [#allocation5]   ;;  %v21_v0 = vld [vmem:[#allocation2] sm:$0xff] }
   0xe   :  { %s30_s12 = sshll.u32 %s86_s11, 4  ;;  %v22_v1 = vrot.slane %v21_v0, 7  ;;  %s31_s12 = int_to_ptr.vmem [resolvable:$true] %s30_s12 }
   0xf   :  { %s61_s13 = scalar_lea.vmem %s31_s12, 128  ;;  %p66_p6 = scmp.lt.s32.totalorder %s31_s12, %s31_s12 }
  0x10   :  { %23 = vst [vmem:[#allocation5] sm:$0xff] %v22_v1  ;;  %p62_p5 = scmp.ne.s32.totalorder %s31_s12, %s61_s13  ;;  %p67_p7 = scmp.lt.s32.totalorder %s61_s13, %s61_s13 }
  0x12   :  { %p68_p8 = por %p67_p7, %p66_p6 }
  0x14   :  { %p69_p9 = pnand %p68_p8, %p62_p5 }
  0x16   :  { %72 = shalt.err (!%p69_p9)
}
  0x17   :  { %33 = dma.vmem_to_hbm [thread:$0]  %s31_s12, 128, %s104_s1, [#allocation4]  }
  0x18   :  { %83 = dma.done.wait [#allocation4], 128  }
  0x19   :  { %84 = vsyncadd [#allocation4], 4294967168 }
  0x1a   :  { %37 = vsyncpa [#allocation3], 1 }
  0x1b   :  { %38 = vsyncpa [#allocation4], 1 }

</bundles_post_ra>
